<compile_context>
chip_gen: v6e
topology: v6e:2x2x1
jax: 0.10.0
libtpu: 0.0.40
codegen_flags: <defaults>
</compile_context>

<pallas_src>
import jax
import jax.numpy as jnp
from jax.experimental import pallas as pl
from jax.experimental.pallas import tpu as pltpu


def _dma_copy_kernel(x_ref, o_ref, sem):
    # Pure identity copy: one HBM->HBM DMA of the whole array. Zero compute,
    # zero VMEM, no per-tile overhead — pure memory bandwidth.
    cp = pltpu.make_async_copy(x_ref, o_ref, sem)
    cp.start()
    cp.wait()


def _pallas_materializing_copy(a: jax.Array) -> jax.Array:
    """Bit-exact copy of `a` through a Pallas HBM->HBM DMA (breaks aliasing)."""
    nbytes = a.size * jnp.dtype(a.dtype).itemsize
    return pl.pallas_call(
        _dma_copy_kernel,
        out_shape=jax.ShapeDtypeStruct(a.shape, a.dtype),
        in_specs=[pl.BlockSpec(memory_space=pl.ANY)],
        out_specs=pl.BlockSpec(memory_space=pl.ANY),
        scratch_shapes=[pltpu.SemaphoreType.DMA],
        cost_estimate=pl.CostEstimate(
            flops=0, transcendentals=0, bytes_accessed=2 * nbytes
        ),
    )(a)


class Reshape:
    """JAX/Pallas equivalent of the PyTorch Reshape module.

    By default returns a metadata-only reshape (same as torch.reshape on a
    contiguous tensor). With use_pallas=True the result is additionally
    materialized via a Pallas HBM->HBM DMA copy, for callers that need the
    output to be a distinct buffer (no aliasing with the input).
    """

    def __init__(self, dim, *, use_pallas: bool = False):
        # Matches the torch module: final shape is (-1,) + dim
        self.dim = (-1,) + tuple(dim)
        self.use_pallas = use_pallas

    def __call__(self, x: jax.Array) -> jax.Array:
        y = x.reshape(self.dim)               # metadata-only re-interpretation
        if not self.use_pallas:
            return y                          # fast path: free
        return _pallas_materializing_copy(y)  # explicit copy contract holds
                                              # for every shape / element count


if __name__ == "__main__":
    key = jax.random.PRNGKey(0)

    # Input consistent with an NCHW conv activation: batch=2, channels=4, 16x16
    x = jax.random.normal(key, (2, 4, 16, 16), dtype=jnp.float32)
    ref = jnp.reshape(x, (-1, 8, 8, 16))

    # 1) Default (recommended) path: metadata-only reshape, no Pallas kernel.
    module = Reshape(dim=(8, 8, 16))
    out_default = jax.block_until_ready(module(x))
    assert out_default.shape == (2, 8, 8, 16), out_default.shape
    assert out_default.dtype == x.dtype
    assert bool(jnp.array_equal(out_default, ref))

    # 2) Flag-gated Pallas HBM->HBM DMA copy path.
    module_pallas = Reshape(dim=(8, 8, 16), use_pallas=True)
    out_pallas = jax.block_until_ready(module_pallas(x))
    assert out_pallas.shape == (2, 8, 8, 16), out_pallas.shape
    assert out_pallas.dtype == x.dtype
    assert bool(jnp.array_equal(out_pallas, ref))

    # 3) Element count NOT a multiple of 128 (105 elements) — previously this
    #    silently skipped the copy; now it goes through the same DMA path.
    key2 = jax.random.PRNGKey(1)
    x_odd = jax.random.normal(key2, (3, 5, 7), dtype=jnp.float32)
    ref_odd = jnp.reshape(x_odd, (-1, 7, 5))
    module_odd = Reshape(dim=(7, 5), use_pallas=True)
    out_odd = jax.block_until_ready(module_odd(x_odd))
    assert out_odd.shape == (3, 7, 5), out_odd.shape
    assert bool(jnp.array_equal(out_odd, ref_odd))

    print("KERNEL_OK")
</pallas_src>

<mosaic_0001>
module attributes {stable_mosaic.version = 11 : i64} {
  func.func @_dma_copy_kernel(%arg0: memref<2x8x8x16xf32, #tpu.memory_space<any>>, %arg1: memref<2x8x8x16xf32, #tpu.memory_space<any>>, %arg2: memref<!tpu.dma_semaphore, #tpu.memory_space<semaphore_mem>>) attributes {dimension_semantics = [], scalar_prefetch = 0 : i64, scratch_operands = 1 : i64, tpu.core_type = #tpu.core_type<tc>} {
    tpu.enqueue_dma source(%arg0 : memref<2x8x8x16xf32, #tpu.memory_space<any>>) target(%arg1 : memref<2x8x8x16xf32, #tpu.memory_space<any>>) target_semaphore(%arg2 : memref<!tpu.dma_semaphore, #tpu.memory_space<semaphore_mem>>)
    tpu.wait_dma2 semaphore(%arg2 : memref<!tpu.dma_semaphore, #tpu.memory_space<semaphore_mem>>) src(%arg0 : memref<2x8x8x16xf32, #tpu.memory_space<any>>) dst(%arg1 : memref<2x8x8x16xf32, #tpu.memory_space<any>>)
    return
  }
}

</mosaic_0001>

<bundles_post_ra>
// kernel: tpu_custom_call.1
= control target key start
LH: loop header
LB: loop body
LE: loop exit
PB: predicated region body
PF: predicated region fallthrough
CT: control target
= control target key end

     0   :  { %s30_s6 = smov [#allocation2]   ;;  %s31_s7 = smov 131072   ;;  %s49_s0 = inlined_call_operand.hbm [shape: f32[2,8,8,16], index: 0, kind: input, shape index: {}]   ;;  %s50_s1 = inlined_call_operand.hbm [shape: f32[2,8,8,16], index: 1, kind: output, shape index: {}]  }
   0x1   :  { %s32_s8 = smov 0  }
   0x2   :  { %12 = dma.general %s49_s0, 2048, %s50_s1, %s30_s6, %s31_s7, [#allocation4], %s32_s8, 0  }
   0x3   :  { %28 = dma.done.wait [#allocation2], 2048 }
   0x4   :  { %29 = vsyncadd [#allocation2], 4294965248 }
   0x5   :  { %18 = vsyncmov [#allocation2] }
   0x8   :  { %s19_s13 = vpop.sfrf %18 }
   0x9   :  { %p24_p0 = scmp.ne.s32.totalorder %s19_s13, 0 }
   0xb   :  { %23 = shalt.err (%p24_p0)  }

</bundles_post_ra>
